<compile_context>
chip_gen: v6e
topology: v6e:2x2x1
jax: 0.10.0
libtpu: 0.0.40
codegen_flags: <defaults>
</compile_context>

<pallas_src>
import functools

import jax
import jax.numpy as jnp
from jax.experimental import pallas as pl
from jax.experimental.pallas import tpu as pltpu

LN_EPS = 1e-5


def _encoder_kernel(res_ref, level_ref,
                    tmix_ref, wdd_ref, w1_ref, w2_ref, vec_ref,
                    level_out_ref, growth_out_ref, season_out_ref,
                    res_sc, lvl_sc,
                    *, Bt, T, D, F):
    """One grid step = one encoder layer applied to one batch tile."""
    l = pl.program_id(1)
    n_layers = pl.num_programs(1)
    M = Bt * T

    # Load carried state into VMEM scratch at the first layer of each tile.
    @pl.when(l == 0)
    def _():
        res_sc[...] = res_ref[...].reshape(M, D).astype(jnp.float32)
        lvl_sc[...] = level_ref[...].reshape(M, D).astype(jnp.float32)

    x = res_sc[...]                     # (M, D) f32
    lvl = lvl_sc[...]                   # (M, D) f32

    # Packed per-layer vectors: rows [g1, b1, g2, b2, bff2, bff1, alpha, pad].
    vec = vec_ref[0]                    # (8, Fmax) f32
    g1, b1 = vec[0:1, :D], vec[1:2, :D]
    g2, b2 = vec[2:3, :D], vec[3:4, :D]
    bff2 = vec[4:5, :D]
    bff1 = vec[5:6, :F]
    alpha = vec[6:7, 0:1]               # (1, 1) level smoothing coefficient

    # Packed weight slabs (bf16).
    s_time = tmix_ref[0, 0]             # (T, T) seasonal time-mix
    a_es = tmix_ref[0, 1]               # (T, T) exponential-smoothing weights
    w_in = wdd_ref[0, 0]                # (D, D)
    w_out = wdd_ref[0, 1]               # (D, D)
    w_lvl = wdd_ref[0, 2]               # (D, D)

    xb = x.astype(jnp.bfloat16).reshape(Bt, T, D)

    # ---- season block: learned time-mixing seasonal extraction ----
    st_b = jnp.broadcast_to(s_time, (Bt, T, T))
    season = jnp.einsum('bts,bsd->btd', st_b, xb,
                        preferred_element_type=jnp.float32).reshape(M, D)
    x1 = x - season

    # ---- growth block: exponential-smoothing attention along time ----
    v = jnp.dot(x1.astype(jnp.bfloat16), w_in,
                preferred_element_type=jnp.float32)
    aes_b = jnp.broadcast_to(a_es, (Bt, T, T))
    smoothed = jnp.einsum('bts,bsd->btd', aes_b,
                          v.astype(jnp.bfloat16).reshape(Bt, T, D),
                          preferred_element_type=jnp.float32).reshape(M, D)
    growth = jnp.dot(smoothed.astype(jnp.bfloat16), w_out,
                     preferred_element_type=jnp.float32)

    # ---- residual + LayerNorm 1 (f32) ----
    h = x1 - growth
    mu = jnp.mean(h, axis=-1, keepdims=True)
    var = jnp.mean((h - mu) ** 2, axis=-1, keepdims=True)
    h = (h - mu) * jax.lax.rsqrt(var + LN_EPS) * g1 + b1

    # ---- feed-forward (sigmoid activation, ETSFormer default) ----
    ff = jax.nn.sigmoid(jnp.dot(h.astype(jnp.bfloat16), w1_ref[0],
                                preferred_element_type=jnp.float32) + bff1)
    ff = jnp.dot(ff.astype(jnp.bfloat16), w2_ref[0],
                 preferred_element_type=jnp.float32) + bff2

    # ---- residual + LayerNorm 2 (f32) ----
    h2 = h + ff
    mu2 = jnp.mean(h2, axis=-1, keepdims=True)
    var2 = jnp.mean((h2 - mu2) ** 2, axis=-1, keepdims=True)
    res_new = (h2 - mu2) * jax.lax.rsqrt(var2 + LN_EPS) * g2 + b2

    # ---- level update (simplified LevelLayer: EWM + projected growth+season) ----
    gs = growth + season
    lvl_new = alpha * lvl + jnp.dot(gs.astype(jnp.bfloat16), w_lvl,
                                    preferred_element_type=jnp.float32)

    # Carry to the next layer (VMEM-resident; no HBM round-trip per layer).
    res_sc[...] = res_new
    lvl_sc[...] = lvl_new

    # Per-layer outputs.
    growth_out_ref[0] = growth.reshape(Bt, T, D)
    season_out_ref[0] = season.reshape(Bt, T, D)

    # Final level is written once per batch tile (accumulator pattern on `l`).
    @pl.when(l == n_layers - 1)
    def _():
        level_out_ref[...] = lvl_new.reshape(Bt, T, D)


def _stack_layer_params(layer_params_list):
    """Stack per-layer params with a leading L axis; pack matrices and vectors.

    Matrices are packed into few large bf16 slabs (fewer DMAs per layer step);
    LN/bias/alpha vectors are packed into one f32 (L, 8, max(D, F)) slab.
    """
    D = layer_params_list[0]["w_in"].shape[0]
    F_ = layer_params_list[0]["w1"].shape[1]
    fmax = max(D, F_)

    tmix = jnp.stack([jnp.stack([p["s_time"], p["a_es"]])
                      for p in layer_params_list]).astype(jnp.bfloat16)     # (L,2,T,T)
    wdd = jnp.stack([jnp.stack([p["w_in"], p["w_out"], p["w_lvl"]])
                     for p in layer_params_list]).astype(jnp.bfloat16)      # (L,3,D,D)
    w1 = jnp.stack([p["w1"] for p in layer_params_list]).astype(jnp.bfloat16)
    w2 = jnp.stack([p["w2"] for p in layer_params_list]).astype(jnp.bfloat16)

    vec_rows = []
    for p in layer_params_list:
        rows = jnp.zeros((8, fmax), jnp.float32)
        rows = rows.at[0, :D].set(p["g1"][0])
        rows = rows.at[1, :D].set(p["b1"][0])
        rows = rows.at[2, :D].set(p["g2"][0])
        rows = rows.at[3, :D].set(p["b2"][0])
        rows = rows.at[4, :D].set(p["bff2"][0])
        rows = rows.at[5, :F_].set(p["bff1"][0])
        rows = rows.at[6, 0].set(jnp.float32(p["alpha_level"]))
        vec_rows.append(rows)

    return dict(tmix=tmix, wdd=wdd, w1=w1, w2=w2, vec=jnp.stack(vec_rows))


def encoder_forward(res, level, layer_params_list, attn_mask=None, batch_tile=None):
    """Mirrors Encoder.forward: all layers fused into one pallas_call."""
    del attn_mask
    B, T, D = res.shape
    L = len(layer_params_list)
    F_ = layer_params_list[0]["w1"].shape[1]

    stacked = _stack_layer_params(layer_params_list)
    fmax = stacked["vec"].shape[-1]

    # Fuse the whole batch into one block by default (bigger MXU M-dim, fewer
    # grid steps). Pass batch_tile to split for multi-core / large-B cases.
    if batch_tile is None:
        batch_tile = B
    assert B % batch_tile == 0
    num_bt = B // batch_tile

    kernel = functools.partial(_encoder_kernel, Bt=batch_tile, T=T, D=D, F=F_)

    act_spec = pl.BlockSpec((batch_tile, T, D), lambda bt, l: (bt, 0, 0))

    def w_spec(*shape):
        n = len(shape)
        return pl.BlockSpec((1,) + shape, lambda bt, l, _n=n: (l,) + (0,) * _n)

    # Advisory cost estimate for XLA scheduling around the call.
    flops_per_layer = (2 * B * T * T * D * 2          # season + ES time mixes
                       + 2 * B * T * D * D * 3        # w_in, w_out, w_lvl
                       + 2 * B * T * D * F_ * 2)      # feed-forward
    weight_bytes = sum(int(stacked[k].size) * stacked[k].dtype.itemsize
                       for k in ("tmix", "wdd", "w1", "w2", "vec"))
    io_bytes = (res.size + level.size) * 4 + B * T * D * 4 + 2 * L * B * T * D * 4
    cost = pl.CostEstimate(flops=L * flops_per_layer,
                           transcendentals=L * B * T * (F_ + 2),
                           bytes_accessed=int(weight_bytes + io_bytes))

    lvl_o, growth_o, season_o = pl.pallas_call(
        kernel,
        grid=(num_bt, L),
        in_specs=[
            act_spec, act_spec,                       # res, level (read at l==0)
            w_spec(2, T, T),                          # s_time + a_es
            w_spec(3, D, D),                          # w_in + w_out + w_lvl
            w_spec(D, F_), w_spec(F_, D),             # w1, w2
            w_spec(8, fmax),                          # packed vectors + alpha
        ],
        out_specs=[
            act_spec,                                 # final level
            pl.BlockSpec((1, batch_tile, T, D), lambda bt, l: (l, bt, 0, 0)),
            pl.BlockSpec((1, batch_tile, T, D), lambda bt, l: (l, bt, 0, 0)),
        ],
        out_shape=[
            jax.ShapeDtypeStruct((B, T, D), jnp.float32),
            jax.ShapeDtypeStruct((L, B, T, D), jnp.float32),
            jax.ShapeDtypeStruct((L, B, T, D), jnp.float32),
        ],
        scratch_shapes=[
            pltpu.VMEM((batch_tile * T, D), jnp.float32),   # res carry
            pltpu.VMEM((batch_tile * T, D), jnp.float32),   # level carry
        ],
        compiler_params=pltpu.CompilerParams(
            dimension_semantics=("parallel", "arbitrary"),
            vmem_limit_bytes=64 * 1024 * 1024),
        cost_estimate=cost,
    )(res, level,
      stacked["tmix"], stacked["wdd"],
      stacked["w1"], stacked["w2"], stacked["vec"])

    growths = [growth_o[i] for i in range(L)]
    seasons = [season_o[i] for i in range(L)]
    season_attns = [p["s_time"] for p in layer_params_list]
    growth_attns = [p["a_es"] for p in layer_params_list]
    return lvl_o, growths, seasons, season_attns, growth_attns


def init_layer_params(key, T, D, F_, alpha_es=0.3, alpha_level=0.9):
    ks = jax.random.split(key, 6)
    t = jnp.arange(T)
    diff = (t[:, None] - t[None, :]).astype(jnp.float32)
    a_es = jnp.where(diff >= 0.0,
                     alpha_es * (1.0 - alpha_es) ** diff,
                     0.0).astype(jnp.float32)
    scale = 0.1
    return dict(
        s_time=scale * jax.random.normal(ks[0], (T, T), jnp.float32),
        a_es=a_es,
        w_in=scale * jax.random.normal(ks[1], (D, D), jnp.float32),
        w_out=scale * jax.random.normal(ks[2], (D, D), jnp.float32),
        g1=jnp.ones((1, D), jnp.float32),
        b1=jnp.zeros((1, D), jnp.float32),
        g2=jnp.ones((1, D), jnp.float32),
        b2=jnp.zeros((1, D), jnp.float32),
        w1=scale * jax.random.normal(ks[3], (D, F_), jnp.float32),
        bff1=jnp.zeros((1, F_), jnp.float32),
        w2=scale * jax.random.normal(ks[4], (F_, D), jnp.float32),
        bff2=jnp.zeros((1, D), jnp.float32),
        w_lvl=scale * jax.random.normal(ks[5], (D, D), jnp.float32),
        alpha_level=alpha_level,
    )


if __name__ == "__main__":
    key = jax.random.PRNGKey(0)
    B, T, D, F_ = 2, 8, 32, 64
    n_layers = 2

    k_res, k_lvl, *k_layers = jax.random.split(key, 2 + n_layers)
    res = jax.random.normal(k_res, (B, T, D), jnp.float32)
    level = jax.random.normal(k_lvl, (B, T, D), jnp.float32)
    layer_params = [init_layer_params(k, T, D, F_) for k in k_layers]

    level_out, growths, seasons, season_attns, growth_attns = encoder_forward(
        res, level, layer_params)

    jax.block_until_ready(level_out)
    jax.block_until_ready(growths)
    jax.block_until_ready(seasons)

    assert level_out.shape == (B, T, D)
    assert len(growths) == n_layers and growths[0].shape == (B, T, D)
    assert len(seasons) == n_layers and seasons[0].shape == (B, T, D)
    assert len(season_attns) == n_layers and len(growth_attns) == n_layers
    assert bool(jnp.all(jnp.isfinite(level_out)))
    print("KERNEL_OK")
</pallas_src>

<mosaic_0001>
module attributes {stable_mosaic.version = 11 : i64} {
  func.func @_encoder_kernel(%arg0: i32, %arg1: i32, %arg2: memref<2x8x32xf32, #tpu.memory_space<vmem>>, %arg3: memref<2x8x32xf32, #tpu.memory_space<vmem>>, %arg4: memref<1x2x8x8xbf16, #tpu.memory_space<vmem>>, %arg5: memref<1x3x32x32xbf16, #tpu.memory_space<vmem>>, %arg6: memref<1x32x64xbf16, #tpu.memory_space<vmem>>, %arg7: memref<1x64x32xbf16, #tpu.memory_space<vmem>>, %arg8: memref<1x8x64xf32, #tpu.memory_space<vmem>>, %arg9: memref<2x8x32xf32, #tpu.memory_space<vmem>>, %arg10: memref<1x2x8x32xf32, #tpu.memory_space<vmem>>, %arg11: memref<1x2x8x32xf32, #tpu.memory_space<vmem>>, %arg12: memref<16x32xf32, #tpu.memory_space<vmem>>, %arg13: memref<16x32xf32, #tpu.memory_space<vmem>>) attributes {dimension_semantics = [#tpu.dimension_semantics<parallel>, #tpu.dimension_semantics<arbitrary>], iteration_bounds = array<i64: 1, 2>, scalar_prefetch = 0 : i64, scratch_operands = 2 : i64, tpu.core_type = #tpu.core_type<tc>, window_params = [{transform_indices = @transform_0, window_bounds = array<i64: 2, 8, 32>}, {transform_indices = @transform_1, window_bounds = array<i64: 2, 8, 32>}, {transform_indices = @transform_2, window_bounds = array<i64: 1, 2, 8, 8>}, {transform_indices = @transform_3, window_bounds = array<i64: 1, 3, 32, 32>}, {transform_indices = @transform_4, window_bounds = array<i64: 1, 32, 64>}, {transform_indices = @transform_5, window_bounds = array<i64: 1, 64, 32>}, {transform_indices = @transform_6, window_bounds = array<i64: 1, 8, 64>}, {transform_indices = @transform_7, window_bounds = array<i64: 2, 8, 32>}, {transform_indices = @transform_8, window_bounds = array<i64: 1, 2, 8, 32>}, {transform_indices = @transform_9, window_bounds = array<i64: 1, 2, 8, 32>}]} {
    %c0_i32 = arith.constant 0 : i32
    %0 = arith.cmpi eq, %arg1, %c0_i32 : i32
    %1 = arith.extui %0 : i1 to i32
    %c0_i32_0 = arith.constant 0 : i32
    %2 = arith.cmpi ne, %1, %c0_i32_0 : i32
    scf.if %2 {
      %c0_61 = arith.constant 0 : index
      %c0_62 = arith.constant 0 : index
      %c0_63 = arith.constant 0 : index
      %123 = vector.load %arg2[%c0_61, %c0_62, %c0_63] : memref<2x8x32xf32, #tpu.memory_space<vmem>>, vector<2x8x32xf32>
      %124 = vector.shape_cast %123 : vector<2x8x32xf32> to vector<16x32xf32>
      %c0_64 = arith.constant 0 : index
      %c0_65 = arith.constant 0 : index
      %125 = vector.load %arg12[%c0_64, %c0_65] : memref<16x32xf32, #tpu.memory_space<vmem>>, vector<16x32xf32>
      tpu.vector_store %arg12[%c0_64, %c0_65], %124 {strides = array<i32>} : memref<16x32xf32, #tpu.memory_space<vmem>>, vector<16x32xf32>,
      %c0_66 = arith.constant 0 : index
      %c0_67 = arith.constant 0 : index
      %c0_68 = arith.constant 0 : index
      %126 = vector.load %arg3[%c0_66, %c0_67, %c0_68] : memref<2x8x32xf32, #tpu.memory_space<vmem>>, vector<2x8x32xf32>
      %127 = vector.shape_cast %126 : vector<2x8x32xf32> to vector<16x32xf32>
      %c0_69 = arith.constant 0 : index
      %c0_70 = arith.constant 0 : index
      %128 = vector.load %arg13[%c0_69, %c0_70] : memref<16x32xf32, #tpu.memory_space<vmem>>, vector<16x32xf32>
      tpu.vector_store %arg13[%c0_69, %c0_70], %127 {strides = array<i32>} : memref<16x32xf32, #tpu.memory_space<vmem>>, vector<16x32xf32>,
    } else {
    }
    %c0 = arith.constant 0 : index
    %c0_1 = arith.constant 0 : index
    %3 = vector.load %arg12[%c0, %c0_1] : memref<16x32xf32, #tpu.memory_space<vmem>>, vector<16x32xf32>
    %c0_2 = arith.constant 0 : index
    %c0_3 = arith.constant 0 : index
    %4 = vector.load %arg13[%c0_2, %c0_3] : memref<16x32xf32, #tpu.memory_space<vmem>>, vector<16x32xf32>
    %c0_4 = arith.constant 0 : index
    %c0_5 = arith.constant 0 : index
    %c0_6 = arith.constant 0 : index
    %5 = vector.load %arg8[%c0_4, %c0_5, %c0_6] : memref<1x8x64xf32, #tpu.memory_space<vmem>>, vector<1x8x64xf32>
    %6 = vector.shape_cast %5 : vector<1x8x64xf32> to vector<8x64xf32>
    %7 = vector.extract_strided_slice %6 {offsets = [0, 0], sizes = [1, 32], strides = [1, 1]} : vector<8x64xf32> to vector<1x32xf32>
    %8 = vector.extract_strided_slice %6 {offsets = [1, 0], sizes = [1, 32], strides = [1, 1]} : vector<8x64xf32> to vector<1x32xf32>
    %9 = vector.extract_strided_slice %6 {offsets = [2, 0], sizes = [1, 32], strides = [1, 1]} : vector<8x64xf32> to vector<1x32xf32>
    %10 = vector.extract_strided_slice %6 {offsets = [3, 0], sizes = [1, 32], strides = [1, 1]} : vector<8x64xf32> to vector<1x32xf32>
    %11 = vector.extract_strided_slice %6 {offsets = [4, 0], sizes = [1, 32], strides = [1, 1]} : vector<8x64xf32> to vector<1x32xf32>
    %12 = vector.extract_strided_slice %6 {offsets = [5, 0], sizes = [1, 64], strides = [1, 1]} : vector<8x64xf32> to vector<1x64xf32>
    %13 = vector.extract_strided_slice %6 {offsets = [6, 0], sizes = [1, 1], strides = [1, 1]} : vector<8x64xf32> to vector<1x1xf32>
    %c0_7 = arith.constant 0 : index
    %c0_8 = arith.constant 0 : index
    %c0_9 = arith.constant 0 : index
    %c0_10 = arith.constant 0 : index
    %14 = vector.load %arg4[%c0_7, %c0_8, %c0_9, %c0_10] : memref<1x2x8x8xbf16, #tpu.memory_space<vmem>>, vector<1x1x8x8xbf16>
    %15 = vector.shape_cast %14 : vector<1x1x8x8xbf16> to vector<8x8xbf16>
    %c0_11 = arith.constant 0 : index
    %c1 = arith.constant 1 : index
    %c0_12 = arith.constant 0 : index
    %c0_13 = arith.constant 0 : index
    %16 = vector.load %arg4[%c0_11, %c1, %c0_12, %c0_13] : memref<1x2x8x8xbf16, #tpu.memory_space<vmem>>, vector<1x1x8x8xbf16>
    %17 = vector.shape_cast %16 : vector<1x1x8x8xbf16> to vector<8x8xbf16>
    %c0_14 = arith.constant 0 : index
    %c0_15 = arith.constant 0 : index
    %c0_16 = arith.constant 0 : index
    %c0_17 = arith.constant 0 : index
    %18 = vector.load %arg5[%c0_14, %c0_15, %c0_16, %c0_17] : memref<1x3x32x32xbf16, #tpu.memory_space<vmem>>, vector<1x1x32x32xbf16>
    %19 = vector.shape_cast %18 : vector<1x1x32x32xbf16> to vector<32x32xbf16>
    %c0_18 = arith.constant 0 : index
    %c1_19 = arith.constant 1 : index
    %c0_20 = arith.constant 0 : index
    %c0_21 = arith.constant 0 : index
    %20 = vector.load %arg5[%c0_18, %c1_19, %c0_20, %c0_21] : memref<1x3x32x32xbf16, #tpu.memory_space<vmem>>, vector<1x1x32x32xbf16>
    %21 = vector.shape_cast %20 : vector<1x1x32x32xbf16> to vector<32x32xbf16>
    %c0_22 = arith.constant 0 : index
    %c2 = arith.constant 2 : index
    %c0_23 = arith.constant 0 : index
    %c0_24 = arith.constant 0 : index
    %22 = vector.load %arg5[%c0_22, %c2, %c0_23, %c0_24] : memref<1x3x32x32xbf16, #tpu.memory_space<vmem>>, vector<1x1x32x32xbf16>
    %23 = vector.shape_cast %22 : vector<1x1x32x32xbf16> to vector<32x32xbf16>
    %24 = arith.truncf %3 : vector<16x32xf32> to vector<16x32xbf16>
    %25 = vector.shape_cast %24 : vector<16x32xbf16> to vector<2x8x32xbf16>
    %26 = vector.shape_cast %15 : vector<8x8xbf16> to vector<1x8x8xbf16>
    %27 = vector.broadcast %26 : vector<1x8x8xbf16> to vector<2x8x8xbf16>
    "tpu.trace_start"() <{level = 10 : i32, message = "bts,bsd->btd"}> : () -> ()
    %cst = arith.constant dense<0.000000e+00> : vector<2x8x32xf32>
    %28 = tpu.matmul %27, %25, %cst {dimension_numbers = #tpu.dot_dimension_numbers<[2], [1], [1], [2], [0, 0, 0, 1, 1, 2], [0], [0]>} : vector<2x8x8xbf16>, vector<2x8x32xbf16>, vector<2x8x32xf32> -> vector<2x8x32xf32>
    "tpu.trace_stop"() : () -> ()
    %29 = vector.shape_cast %28 : vector<2x8x32xf32> to vector<16x32xf32>
    %30 = arith.subf %3, %29 : vector<16x32xf32>
    %31 = arith.truncf %30 : vector<16x32xf32> to vector<16x32xbf16>
    %cst_25 = arith.constant dense<0.000000e+00> : vector<16x32xf32>
    %32 = tpu.matmul %31, %19, %cst_25 {dimension_numbers = #tpu.dot_dimension_numbers<[1], [0], [0], [1], [0, 0, 1, 1], [], []>} : vector<16x32xbf16>, vector<32x32xbf16>, vector<16x32xf32> -> vector<16x32xf32>
    %33 = vector.shape_cast %17 : vector<8x8xbf16> to vector<1x8x8xbf16>
    %34 = vector.broadcast %33 : vector<1x8x8xbf16> to vector<2x8x8xbf16>
    %35 = arith.truncf %32 : vector<16x32xf32> to vector<16x32xbf16>
    %36 = vector.shape_cast %35 : vector<16x32xbf16> to vector<2x8x32xbf16>
    "tpu.trace_start"() <{level = 10 : i32, message = "bts,bsd->btd"}> : () -> ()
    %cst_26 = arith.constant dense<0.000000e+00> : vector<2x8x32xf32>
    %37 = tpu.matmul %34, %36, %cst_26 {dimension_numbers = #tpu.dot_dimension_numbers<[2], [1], [1], [2], [0, 0, 0, 1, 1, 2], [0], [0]>} : vector<2x8x8xbf16>, vector<2x8x32xbf16>, vector<2x8x32xf32> -> vector<2x8x32xf32>
    "tpu.trace_stop"() : () -> ()
    %38 = vector.shape_cast %37 : vector<2x8x32xf32> to vector<16x32xf32>
    %39 = arith.truncf %38 : vector<16x32xf32> to vector<16x32xbf16>
    %cst_27 = arith.constant dense<0.000000e+00> : vector<16x32xf32>
    %40 = tpu.matmul %39, %21, %cst_27 {dimension_numbers = #tpu.dot_dimension_numbers<[1], [0], [0], [1], [0, 0, 1, 1], [], []>} : vector<16x32xbf16>, vector<32x32xbf16>, vector<16x32xf32> -> vector<16x32xf32>
    %41 = arith.subf %30, %40 : vector<16x32xf32>
    %cst_28 = arith.constant dense<0.000000e+00> : vector<16xf32>
    %42 = vector.multi_reduction <add>, %41, %cst_28 [1] : vector<16x32xf32> to vector<16xf32>
    %43 = vector.shape_cast %42 : vector<16xf32> to vector<16x1xf32>
    %cst_29 = arith.constant 3.200000e+01 : f32
    %44 = vector.broadcast %cst_29 : f32 to vector<16x1xf32>
    %45 = arith.divf %43, %44 : vector<16x1xf32>
    %46 = vector.broadcast %45 : vector<16x1xf32> to vector<16x32xf32>
    %47 = arith.subf %41, %46 : vector<16x32xf32>
    %48 = arith.mulf %47, %47 : vector<16x32xf32>
    %cst_30 = arith.constant dense<0.000000e+00> : vector<16xf32>
    %49 = vector.multi_reduction <add>, %48, %cst_30 [1] : vector<16x32xf32> to vector<16xf32>
    %50 = vector.shape_cast %49 : vector<16xf32> to vector<16x1xf32>
    %cst_31 = arith.constant 3.200000e+01 : f32
    %51 = vector.broadcast %cst_31 : f32 to vector<16x1xf32>
    %52 = arith.divf %50, %51 : vector<16x1xf32>
    %53 = vector.broadcast %45 : vector<16x1xf32> to vector<16x32xf32>
    %54 = arith.subf %41, %53 : vector<16x32xf32>
    %cst_32 = arith.constant 9.99999974E-6 : f32
    %55 = vector.broadcast %cst_32 : f32 to vector<16x1xf32>
    %56 = arith.addf %52, %55 : vector<16x1xf32>
    %57 = math.rsqrt %56 : vector<16x1xf32>
    %58 = vector.broadcast %57 : vector<16x1xf32> to vector<16x32xf32>
    %59 = arith.mulf %54, %58 : vector<16x32xf32>
    %60 = vector.broadcast %7 : vector<1x32xf32> to vector<16x32xf32>
    %61 = arith.mulf %59, %60 : vector<16x32xf32>
    %62 = vector.broadcast %8 : vector<1x32xf32> to vector<16x32xf32>
    %63 = arith.addf %61, %62 : vector<16x32xf32>
    %64 = arith.truncf %63 : vector<16x32xf32> to vector<16x32xbf16>
    %c0_33 = arith.constant 0 : index
    %c0_34 = arith.constant 0 : index
    %c0_35 = arith.constant 0 : index
    %65 = vector.load %arg6[%c0_33, %c0_34, %c0_35] : memref<1x32x64xbf16, #tpu.memory_space<vmem>>, vector<1x32x64xbf16>
    %66 = vector.shape_cast %65 : vector<1x32x64xbf16> to vector<32x64xbf16>
    %cst_36 = arith.constant dense<0.000000e+00> : vector<16x64xf32>
    %67 = tpu.matmul %64, %66, %cst_36 {dimension_numbers = #tpu.dot_dimension_numbers<[1], [0], [0], [1], [0, 0, 1, 1], [], []>} : vector<16x32xbf16>, vector<32x64xbf16>, vector<16x64xf32> -> vector<16x64xf32>
    %68 = vector.broadcast %12 : vector<1x64xf32> to vector<16x64xf32>
    %69 = arith.addf %67, %68 : vector<16x64xf32>
    %70 = arith.negf %69 : vector<16x64xf32>
    %71 = math.exp %70 : vector<16x64xf32>
    %cst_37 = arith.constant 1.000000e+00 : f32
    %72 = vector.broadcast %cst_37 : f32 to vector<16x64xf32>
    %73 = arith.addf %72, %71 : vector<16x64xf32>
    %74 = arith.divf %72, %73 : vector<16x64xf32>
    %75 = arith.truncf %74 : vector<16x64xf32> to vector<16x64xbf16>
    %c0_38 = arith.constant 0 : index
    %c0_39 = arith.constant 0 : index
    %c0_40 = arith.constant 0 : index
    %76 = vector.load %arg7[%c0_38, %c0_39, %c0_40] : memref<1x64x32xbf16, #tpu.memory_space<vmem>>, vector<1x64x32xbf16>
    %77 = vector.shape_cast %76 : vector<1x64x32xbf16> to vector<64x32xbf16>
    %cst_41 = arith.constant dense<0.000000e+00> : vector<16x32xf32>
    %78 = tpu.matmul %75, %77, %cst_41 {dimension_numbers = #tpu.dot_dimension_numbers<[1], [0], [0], [1], [0, 0, 1, 1], [], []>} : vector<16x64xbf16>, vector<64x32xbf16>, vector<16x32xf32> -> vector<16x32xf32>
    %79 = vector.broadcast %11 : vector<1x32xf32> to vector<16x32xf32>
    %80 = arith.addf %78, %79 : vector<16x32xf32>
    %81 = arith.addf %63, %80 : vector<16x32xf32>
    %cst_42 = arith.constant dense<0.000000e+00> : vector<16xf32>
    %82 = vector.multi_reduction <add>, %81, %cst_42 [1] : vector<16x32xf32> to vector<16xf32>
    %83 = vector.shape_cast %82 : vector<16xf32> to vector<16x1xf32>
    %cst_43 = arith.constant 3.200000e+01 : f32
    %84 = vector.broadcast %cst_43 : f32 to vector<16x1xf32>
    %85 = arith.divf %83, %84 : vector<16x1xf32>
    %86 = vector.broadcast %85 : vector<16x1xf32> to vector<16x32xf32>
    %87 = arith.subf %81, %86 : vector<16x32xf32>
    %88 = arith.mulf %87, %87 : vector<16x32xf32>
    %cst_44 = arith.constant dense<0.000000e+00> : vector<16xf32>
    %89 = vector.multi_reduction <add>, %88, %cst_44 [1] : vector<16x32xf32> to vector<16xf32>
    %90 = vector.shape_cast %89 : vector<16xf32> to vector<16x1xf32>
    %cst_45 = arith.constant 3.200000e+01 : f32
    %91 = vector.broadcast %cst_45 : f32 to vector<16x1xf32>
    %92 = arith.divf %90, %91 : vector<16x1xf32>
    %93 = vector.broadcast %85 : vector<16x1xf32> to vector<16x32xf32>
    %94 = arith.subf %81, %93 : vector<16x32xf32>
    %cst_46 = arith.constant 9.99999974E-6 : f32
    %95 = vector.broadcast %cst_46 : f32 to vector<16x1xf32>
    %96 = arith.addf %92, %95 : vector<16x1xf32>
    %97 = math.rsqrt %96 : vector<16x1xf32>
    %98 = vector.broadcast %97 : vector<16x1xf32> to vector<16x32xf32>
    %99 = arith.mulf %94, %98 : vector<16x32xf32>
    %100 = vector.broadcast %9 : vector<1x32xf32> to vector<16x32xf32>
    %101 = arith.mulf %99, %100 : vector<16x32xf32>
    %102 = vector.broadcast %10 : vector<1x32xf32> to vector<16x32xf32>
    %103 = arith.addf %101, %102 : vector<16x32xf32>
    %104 = arith.addf %40, %29 : vector<16x32xf32>
    %105 = vector.broadcast %13 : vector<1x1xf32> to vector<16x32xf32>
    %106 = arith.mulf %105, %4 : vector<16x32xf32>
    %107 = arith.truncf %104 : vector<16x32xf32> to vector<16x32xbf16>
    %cst_47 = arith.constant dense<0.000000e+00> : vector<16x32xf32>
    %108 = tpu.matmul %107, %23, %cst_47 {dimension_numbers = #tpu.dot_dimension_numbers<[1], [0], [0], [1], [0, 0, 1, 1], [], []>} : vector<16x32xbf16>, vector<32x32xbf16>, vector<16x32xf32> -> vector<16x32xf32>
    %109 = arith.addf %106, %108 : vector<16x32xf32>
    %c0_48 = arith.constant 0 : index
    %c0_49 = arith.constant 0 : index
    %110 = vector.load %arg12[%c0_48, %c0_49] : memref<16x32xf32, #tpu.memory_space<vmem>>, vector<16x32xf32>
    tpu.vector_store %arg12[%c0_48, %c0_49], %103 {strides = array<i32>} : memref<16x32xf32, #tpu.memory_space<vmem>>, vector<16x32xf32>,
    %c0_50 = arith.constant 0 : index
    %c0_51 = arith.constant 0 : index
    %111 = vector.load %arg13[%c0_50, %c0_51] : memref<16x32xf32, #tpu.memory_space<vmem>>, vector<16x32xf32>
    tpu.vector_store %arg13[%c0_50, %c0_51], %109 {strides = array<i32>} : memref<16x32xf32, #tpu.memory_space<vmem>>, vector<16x32xf32>,
    %112 = vector.shape_cast %40 : vector<16x32xf32> to vector<2x8x32xf32>
    %c0_52 = arith.constant 0 : index
    %c0_53 = arith.constant 0 : index
    %c0_54 = arith.constant 0 : index
    %c0_55 = arith.constant 0 : index
    %113 = vector.load %arg10[%c0_52, %c0_53, %c0_54, %c0_55] : memref<1x2x8x32xf32, #tpu.memory_space<vmem>>, vector<1x2x8x32xf32>
    %114 = vector.shape_cast %113 : vector<1x2x8x32xf32> to vector<2x8x32xf32>
    %115 = vector.shape_cast %112 : vector<2x8x32xf32> to vector<1x2x8x32xf32>
    tpu.vector_store %arg10[%c0_52, %c0_53, %c0_54, %c0_55], %115 {strides = array<i32>} : memref<1x2x8x32xf32, #tpu.memory_space<vmem>>, vector<1x2x8x32xf32>,
    %116 = vector.shape_cast %29 : vector<16x32xf32> to vector<2x8x32xf32>
    %c0_56 = arith.constant 0 : index
    %c0_57 = arith.constant 0 : index
    %c0_58 = arith.constant 0 : index
    %c0_59 = arith.constant 0 : index
    %117 = vector.load %arg11[%c0_56, %c0_57, %c0_58, %c0_59] : memref<1x2x8x32xf32, #tpu.memory_space<vmem>>, vector<1x2x8x32xf32>
    %118 = vector.shape_cast %117 : vector<1x2x8x32xf32> to vector<2x8x32xf32>
    %119 = vector.shape_cast %116 : vector<2x8x32xf32> to vector<1x2x8x32xf32>
    tpu.vector_store %arg11[%c0_56, %c0_57, %c0_58, %c0_59], %119 {strides = array<i32>} : memref<1x2x8x32xf32, #tpu.memory_space<vmem>>, vector<1x2x8x32xf32>,
    %c1_i32 = arith.constant 1 : i32
    %120 = arith.cmpi eq, %arg1, %c1_i32 : i32
    %121 = arith.extui %120 : i1 to i32
    %c0_i32_60 = arith.constant 0 : i32
    %122 = arith.cmpi ne, %121, %c0_i32_60 : i32
    scf.if %122 {
      %123 = vector.shape_cast %109 : vector<16x32xf32> to vector<2x8x32xf32>
      %c0_61 = arith.constant 0 : index
      %c0_62 = arith.constant 0 : index
      %c0_63 = arith.constant 0 : index
      %124 = vector.load %arg9[%c0_61, %c0_62, %c0_63] : memref<2x8x32xf32, #tpu.memory_space<vmem>>, vector<2x8x32xf32>
      tpu.vector_store %arg9[%c0_61, %c0_62, %c0_63], %123 {strides = array<i32>} : memref<2x8x32xf32, #tpu.memory_space<vmem>>, vector<2x8x32xf32>,
    } else {
    }
    return
  }
  func.func @transform_0(%arg0: i32, %arg1: i32) -> (i32, i32, i32) {
    %c0_i32 = arith.constant 0 : i32
    %c0_i32_0 = arith.constant 0 : i32
    %c0_i32_1 = arith.constant 0 : i32
    return %arg0, %c0_i32, %c0_i32_0 : i32, i32, i32
  }
  func.func @transform_1(%arg0: i32, %arg1: i32) -> (i32, i32, i32) {
    %c0_i32 = arith.constant 0 : i32
    %c0_i32_0 = arith.constant 0 : i32
    %c0_i32_1 = arith.constant 0 : i32
    return %arg0, %c0_i32, %c0_i32_0 : i32, i32, i32
  }
  func.func @transform_2(%arg0: i32, %arg1: i32) -> (i32, i32, i32, i32) {
    %c0_i32 = arith.constant 0 : i32
    %c0_i32_0 = arith.constant 0 : i32
    %c0_i32_1 = arith.constant 0 : i32
    %c0_i32_2 = arith.constant 0 : i32
    return %arg1, %c0_i32, %c0_i32_0, %c0_i32_1 : i32, i32, i32, i32
  }
  func.func @transform_3(%arg0: i32, %arg1: i32) -> (i32, i32, i32, i32) {
    %c0_i32 = arith.constant 0 : i32
    %c0_i32_0 = arith.constant 0 : i32
    %c0_i32_1 = arith.constant 0 : i32
    %c0_i32_2 = arith.constant 0 : i32
    return %arg1, %c0_i32, %c0_i32_0, %c0_i32_1 : i32, i32, i32, i32
  }
  func.func @transform_4(%arg0: i32, %arg1: i32) -> (i32, i32, i32) {
    %c0_i32 = arith.constant 0 : i32
    %c0_i32_0 = arith.constant 0 : i32
    %c0_i32_1 = arith.constant 0 : i32
    return %arg1, %c0_i32, %c0_i32_0 : i32, i32, i32
  }
  func.func @transform_5(%arg0: i32, %arg1: i32) -> (i32, i32, i32) {
    %c0_i32 = arith.constant 0 : i32
    %c0_i32_0 = arith.constant 0 : i32
    %c0_i32_1 = arith.constant 0 : i32
    return %arg1, %c0_i32, %c0_i32_0 : i32, i32, i32
  }
  func.func @transform_6(%arg0: i32, %arg1: i32) -> (i32, i32, i32) {
    %c0_i32 = arith.constant 0 : i32
    %c0_i32_0 = arith.constant 0 : i32
    %c0_i32_1 = arith.constant 0 : i32
    return %arg1, %c0_i32, %c0_i32_0 : i32, i32, i32
  }
  func.func @transform_7(%arg0: i32, %arg1: i32) -> (i32, i32, i32) {
    %c0_i32 = arith.constant 0 : i32
    %c0_i32_0 = arith.constant 0 : i32
    %c0_i32_1 = arith.constant 0 : i32
    return %arg0, %c0_i32, %c0_i32_0 : i32, i32, i32
  }
  func.func @transform_8(%arg0: i32, %arg1: i32) -> (i32, i32, i32, i32) {
    %c0_i32 = arith.constant 0 : i32
    %c0_i32_0 = arith.constant 0 : i32
    %c0_i32_1 = arith.constant 0 : i32
    return %arg1, %arg0, %c0_i32, %c0_i32_0 : i32, i32, i32, i32
  }
  func.func @transform_9(%arg0: i32, %arg1: i32) -> (i32, i32, i32, i32) {
    %c0_i32 = arith.constant 0 : i32
    %c0_i32_0 = arith.constant 0 : i32
    %c0_i32_1 = arith.constant 0 : i32
    return %arg1, %arg0, %c0_i32, %c0_i32_0 : i32, i32, i32, i32
  }
}

</mosaic_0001>

<bundles_post_ra>
// kernel: tpu_custom_call.1
= control target key start
LH: loop header
LB: loop body
LE: loop exit
PB: predicated region body
PF: predicated region fallthrough
CT: control target
= control target key end

     0   :  { %s2585_s0 = inlined_call_operand.hbm [shape: f32[2,8,32], index: 0, kind: input, shape index: {}]   ;;  %s2586_s1 = inlined_call_operand.hbm [shape: f32[2,8,32], index: 1, kind: input, shape index: {}]   ;;  %s2587_s2 = inlined_call_operand.hbm [shape: bf16[2,2,8,8], index: 2, kind: input, shape index: {}]   ;;  %s2588_s3 = inlined_call_operand.vmem [shape: bf16[2,3,32,32], index: 3, kind: input, shape index: {}]   ;;  %s2589_s4 = inlined_call_operand.hbm [shape: bf16[2,32,64], index: 4, kind: input, shape index: {}]   ;;  %s2590_s5 = inlined_call_operand.vmem [shape: bf16[2,64,32], index: 5, kind: input, shape index: {}]   ;;  %s2591_s6 = inlined_call_operand.hbm [shape: f32[2,8,64], index: 6, kind: input, shape index: {}]   ;;  %s2592_s7 = inlined_call_operand.hbm [shape: f32[2,8,32], index: 7, kind: output, shape index: {0}]   ;;  %s2593_s8 = inlined_call_operand.hbm [shape: f32[2,2,8,32], index: 8, kind: output, shape index: {1}]   ;;  %s2594_s9 = inlined_call_operand.hbm [shape: f32[2,2,8,32], index: 9, kind: output, shape index: {2}]  }
   0x1   :  { %2611 = sst [smem:[#allocation25_spill]] %s2585_s0 }
   0x2   :  { %2612 = sst [smem:[#allocation26_spill]] %s2587_s2 }
   0x3   :  { %2613 = sst [smem:[#allocation27_spill]] %s2588_s3 }
   0x4   :  { %2614 = sst [smem:[#allocation28_spill]] %s2590_s5 }
   0x5   :  { %2615 = sst [smem:[#allocation29_spill]] %s2592_s7 }
   0x6   :  { %2616 = sst [smem:[#allocation30_spill]] %s2593_s8 }
   0x7   :  { %2617 = sst [smem:[#allocation31_spill]] %s2594_s9 }
   0x8   :  { %15 = vsyncpa [#allocation5], 0 }
   0x9   :  { %16 = vsyncpa [#allocation8], 0 }
   0xa   :  { %17 = vsyncpa [#allocation6], 0 }
   0xb   :  { %18 = vsyncpa [#allocation14], 0 }
   0xc   :  { %20 = vsyncpa [#allocation14 + $0x1], 0  ;;  %s2142_s30 = smov 0   ;;  %s2144_s10 = smov 0  }
   0xd   :  { %s2146_s11 = smov 0   ;;  %s2148_s12 = smov 0  }
   0xe   :  { %s2150_s13 = smov 0   ;;  %s2152_s14 = smov 0  }
   0xf LB: > { %s2171_s15 = sadd.s32 4294967295, %s2074_s14   ;;  %s2598_s16 = sadd.s32 4294967294, %s2074_s14   ;;  %s2074_s14 = sphi %s2152_s14, %s26_s14   ;;  %s2070_s13 = sphi %s2150_s13, %s2664_s13   ;;  %s2066_s12 = sphi %s2148_s12, %s2663_s12   ;;  %s2062_s11 = sphi %s2146_s11, %s2662_s11   ;;  %s2058_s10 = sphi %s2144_s10, %s2661_s10   ;;  %s2054_s30 = sphi %s2142_s30, %s2660_s30  }
  0x10   : > { %p104_p0 = scmp.ne.s32.totalorder %s2062_s11, %s2058_s10  ;;  %p105_p1 = scmp.eq.s32.totalorder %s2074_s14, 0 }
  0x11   : > { %p110_p2 = scmp.ne.s32.totalorder %s2058_s10, %s2054_s30  ;;  %p2596_p3 = scmp.eq.s32.totalorder %s2171_s15, 0 }
  0x12   : > { %p2595_p4 = scmp.eq.s32.totalorder %s2171_s15, 1  ;;  %p2181_p5 = por %p105_p1, %p104_p0 }
  0x13   : > { %p272_p6 = scmp.eq.s32.totalorder %s2598_s16, 1  ;;  %p2189_p7 = por %p2596_p3, %p110_p2 }
  0x14   : > { %p2195_p8 = por %p2595_p4, %p104_p0  ;;  %p1479_p10 = scmp.ge.s32.totalorder %s2074_s14, 1 }
  0x15   : > { %s2619_s19 = scalar_select %p2189_p7, 1, 0 }
  0x16   : > { %s2620_s20 = scalar_select %p2195_p8, 1, 0 }
  0x17   : > { %p2199_p9 = por %p272_p6, %p110_p2  ;;  %p307_p11 = scmp.lt.s32.totalorder %s2074_s14, 3 }
  0x18   : > { %2621 = sst [smem:[#allocation21_spill]] %s2620_s20  ;;  %s2076_s23 = smov [#allocation4]  }
  0x19   : > { %s2622_s21 = scalar_select %p2199_p9, 1, 0 }
  0x1a   : > { %p2205_p12 = pnand %p1479_p10, %p307_p11  ;;  %s322_s24 = sshll.u32 %s2076_s23, 4  ;;  %s323_s24 = int_to_ptr.vmem [resolvable:$true] %s322_s24 }
  0x1b   : > { %2623 = sst [smem:[#allocation22_spill]] %s2622_s21  ;;  %p1703_p1 = scmp.lt.s32.totalorder %s2074_s14, 2 }
  0x1c   : > { %s2624_s22 = scalar_select %p2205_p12, 1, 0 }
  0x1d   : > { %p1677_p13 = pneg %p2205_p12  ;;  %p2221_p2 = pnand %p1703_p1, %p2181_p5 }
  0x1e   : > { %s35_s27 = sadd.s32 1, %s2070_s13  ;;  %s1807_s29 = scalar_lea.vmem %s323_s24, 256 }
  0x1f   : > { %p2215_p4 = pnand %p1677_p13, %p2596_p3  ;;  %p2226_p6 = scmp.ge.s32.totalorder %s35_s27, 2 }
  0x20   : > { %p1808_p11 = scmp.ne.s32.totalorder %s323_s24, %s1807_s29  ;;  %p1815_p3 = scmp.lt.s32.totalorder %s323_s24, %s323_s24 }
  0x21   : > { %p1798_p10 = pneg %p2215_p4  ;;  %p1816_p9 = scmp.lt.s32.totalorder %s1807_s29, %s1807_s29 }
  0x23   : > { %p1810_p13 = pnand %p1808_p11, %p1798_p10  ;;  %p1817_p8 = por %p1816_p9, %p1815_p3 }
  0x25   : > { %p1811_p0 = pneg %p1810_p13 }
  0x27   : > { %p1818_p5 = pnand %p1817_p8, %p1811_p0 }
  0x29   : > { %1821 = shalt.err (!%p1818_p5)
}
  0x2a   : > { %s2604_s30 = smov 128   ;;  %s2606_s18 = smov 8  }
  0x2b   : > { %s2628_s0 = sld [smem:[#allocation25_spill]]  ;;  %s352_s16 = sand.u32 1, %s2074_s14  }
  0x2c   : > { %s2666_s27 = smov (%p2226_p6, %s35_s27), 0  ;;  %s354_s17 = sand.u32 1, %s2062_s11  }
  0x2d   : > { %2629 = sst [smem:[#allocation23_spill]] %s2666_s27  ;;  %s94_s21 = ssub.s32 %s2070_s13, %s2666_s27 }
  0x2e   : > { %s2253_s7 = sshll.u32 %s354_s17, 3  ;;  %p95_p3 = scmp.eq.s32.totalorder %s94_s21, 0 }
  0x2f   : > { %s2605_s9 = sshll.u32 %s2070_s13, 7  ;;  %s356_s8 = scalar_lea.vmem [#allocation9], %s2253_s7 }
  0x30   : > { %s363_s20 = sshll.u32 %s356_s8, 4  ;;  %s2630_s3 = sadd.s32 1, %s2062_s11  ;;  %s364_s20 = int_to_ptr.vmem [resolvable:$true] %s363_s20 }
  0x31   : > { %1680 = dma.hbm_to_vmem [thread:$0]  (!%p2215_p4), %s2628_s0, 256, %s323_s24, [#allocation5], %s2604_s30, %s2604_s30, %s2606_s18  }
  0x32   : > { %s2260_s5 = scalar_select %p95_p3, %s2062_s11, %s2630_s3  }
  0x33   : > { %s2632_s2 = sld [smem:[#allocation26_spill]]  ;;  %s2267_s29 = scalar_lea.sflag [#allocation5], %s352_s16 }
  0x34   : > { %2631 = sst [smem:[#allocation24_spill]] %s2260_s5  ;;  %p2608_p8 = pneg %p2221_p2 }
  0x35   : > { %s1835_s30 = scalar_lea.vmem %s364_s20, 128  ;;  %s2079_s8 = smov [#allocation9]  }
  0x36   : > { %p1836_p9 = scmp.ne.s32.totalorder %s364_s20, %s1835_s30  ;;  %s1840_s21 = sshll.u32 %s2079_s8, 4  ;;  %s1841_s21 = int_to_ptr.vmem [resolvable:$false] %s1840_s21 }
  0x37   : > { %s1842_s3 = scalar_lea.vmem %s1841_s21, 256  ;;  %p1843_p6 = scmp.lt.s32.totalorder %s364_s20, %s1841_s21 }
  0x38   : > { %p1838_p0 = pnand %p1836_p9, %p2608_p8  ;;  %p1844_p11 = scmp.lt.s32.totalorder %s1842_s3, %s1835_s30 }
  0x39   : > { %s362_s23 = scalar_lea.hbm %s2632_s2, %s2605_s9 }
  0x3a   : > { %p1839_p1 = pneg %p1838_p0  ;;  %p1845_p13 = por %p1844_p11, %p1843_p6 }
  0x3c   : > { %p1846_p5 = pnand %p1845_p13, %p1839_p1 }
  0x3e   : > { %1849 = shalt.err (!%p1846_p5)
}
  0x3f   : > { %s2080_s24 = smov 64   ;;  %s2081_s16 = smov 4  }
  0x40   : > { %1687 = dma.hbm_to_vmem [thread:$0]  (!%p2221_p2), %s362_s23, 128, %s364_s20, %s2267_s29, %s2080_s24, %s2080_s24, %s2081_s16  }
  0x41   : > { %s1486_s28 = sshll.u32 %s354_s17, 4  ;;  %s1551_s9 = sshll.u32 %s2070_s13, 8 }
  0x42   : > { %s391_s21 = scalar_lea.hbm %s2589_s4, %s1551_s9  ;;  %s385_s30 = scalar_lea.vmem [#allocation10], %s1486_s28 }
  0x43   : > { %s392_s3 = sshll.u32 %s385_s30, 4  ;;  %s2082_s0 = smov [#allocation7]   ;;  %s393_s3 = int_to_ptr.vmem [resolvable:$true] %s392_s3 }
  0x44   : > { %s338_s2 = sshll.u32 %s2082_s0, 4  ;;  %s1863_s27 = scalar_lea.vmem %s393_s3, 256  ;;  %s339_s2 = int_to_ptr.vmem [resolvable:$true] %s338_s2 }
  0x45   : > { %p1864_p3 = scmp.ne.s32.totalorder %s393_s3, %s1863_s27  ;;  %s2083_s5 = smov [#allocation10]  }
  0x46   : > { %s1868_s20 = sshll.u32 %s2083_s5, 4  ;;  %s1869_s20 = int_to_ptr.vmem [resolvable:$false] %s1868_s20 }
  0x47   : > { %p1866_p9 = pnand %p1864_p3, %p2608_p8  ;;  %s1870_s17 = scalar_lea.vmem %s1869_s20, 512 }
  0x48   : > { %p1871_p1 = scmp.lt.s32.totalorder %s393_s3, %s1869_s20  ;;  %p1872_p6 = scmp.lt.s32.totalorder %s1870_s17, %s1863_s27 }
  0x49   : > { %p1867_p0 = pneg %p1866_p9 }
  0x4a   : > { %p1873_p11 = por %p1872_p6, %p1871_p1 }
  0x4c   : > { %p1874_p13 = pnand %p1873_p11, %p1867_p0 }
  0x4e   : > { %1877 = shalt.err (!%p1874_p13)
}
  0x4f   : > { %1690 = dma.hbm_to_vmem [thread:$0]  (!%p2221_p2), %s391_s21, 256, %s393_s3, %s2267_s29, %s2080_s24, %s2080_s24, %s2081_s16  }
  0x50   : > { %s1889_s0 = scalar_lea.vmem %s339_s2, 256  ;;  %p1897_p8 = scmp.lt.s32.totalorder %s339_s2, %s339_s2 }
  0x51   : > { %p1890_p5 = scmp.ne.s32.totalorder %s339_s2, %s1889_s0  ;;  %p1898_p7 = scmp.lt.s32.totalorder %s1889_s0, %s1889_s0 }
  0x53   : > { %p1892_p3 = pnand %p1890_p5, %p1798_p10  ;;  %p1899_p12 = por %p1898_p7, %p1897_p8 }
  0x55   : > { %p1893_p9 = pneg %p1892_p3 }
  0x57   : > { %p1900_p1 = pnand %p1899_p12, %p1893_p9 }
  0x59   : > { %1903 = shalt.err (!%p1900_p1)
}
  0x5a   : > { %s2633_s5 = smov 8   ;;  %s2634_s9 = smov 128  }
  0x5b   : > { %1683 = dma.hbm_to_vmem [thread:$0]  (!%p2215_p4), %s2586_s1, 256, %s339_s2, [#allocation8], %s2634_s9, %s2634_s9, %s2633_s5  }
  0x5c   : > { %s2635_s23 = sshll.u32 %s2070_s13, 7  ;;  %s414_s8 = scalar_lea.vmem [#allocation11], %s2253_s7 }
  0x5d   : > { %s419_s28 = scalar_lea.hbm %s2591_s6, %s2635_s23  ;;  %s421_s21 = sshll.u32 %s414_s8, 4  ;;  %s422_s21 = int_to_ptr.vmem [resolvable:$true] %s421_s21 }
  0x5e   : > { %s1917_s30 = scalar_lea.vmem %s422_s21, 128  ;;  %p2636_p12 = pneg %p2221_p2 }
  0x5f   : > { %p1918_p7 = scmp.ne.s32.totalorder %s422_s21, %s1917_s30  ;;  %s2084_s25 = smov [#allocation11]  }
  0x60   : > { %s1922_s3 = sshll.u32 %s2084_s25, 4  ;;  %s1923_s3 = int_to_ptr.vmem [resolvable:$false] %s1922_s3 }
  0x61   : > { %p1920_p10 = pnand %p1918_p7, %p2636_p12  ;;  %s1924_s20 = scalar_lea.vmem %s1923_s3, 256 }
  0x62   : > { %p1925_p0 = scmp.lt.s32.totalorder %s422_s21, %s1923_s3  ;;  %p1926_p4 = scmp.lt.s32.totalorder %s1924_s20, %s1917_s30 }
  0x63   : > { %p1921_p8 = pneg %p1920_p10 }
  0x64   : > { %p1927_p6 = por %p1926_p4, %p1925_p0 }
  0x66   : > { %p1928_p11 = pnand %p1927_p6, %p1921_p8 }
  0x68   : > { %1931 = shalt.err (!%p1928_p11)
}
  0x69   : > { %1693 = dma.hbm_to_vmem [thread:$0]  (!%p2221_p2), %s419_s28, 128, %s422_s21, %s2267_s29  }
  0x6a   : > { %p2637_p13 = scmp.ne.s32.totalorder %s2624_s22, 0 }
  0x6b   : > { %p2638_p5 = scmp.eq.s32.totalorder (!%p2637_p13), %s2171_s15, 0 }
  0x6c   : > { %430 = sbr.rel (%p2637_p13) target bundleno = 2066 (0x812), region = 48 }
  0x71   : > { %2033 = dma.done.wait (%p2638_p5), [#allocation5], 256   ;;  %p2639_p3 = pmov %p2638_p5 }
  0x73   : > { %2035 = vsyncadd (%p2639_p3), [#allocation5], 4294967040  ;;  %p2640_p9 = pmov %p2639_p3 }
  0x74   : > { %p2641_p1 = pmov %p2639_p3 }
  0x75   : > { %2037 = dma.done.wait (%p2640_p9), [#allocation8], 256  }
  0x76   : > { %2039 = vsyncadd (%p2641_p1), [#allocation8], 4294967040  ;;  %s440_s2 = sand.u32 1, %s2171_s15   ;;  %s442_s7 = sand.u32 1, %s2058_s10  }
  0x77   : > { %s2324_s22 = sshll.u32 %s442_s7, 3  ;;  %s441_s26 = scalar_lea.sflag [#allocation5], %s440_s2 }
  0x78   : > { %s444_s29 = scalar_lea.vmem [#allocation9], %s2324_s22  ;;  %p2642_p2 = scmp.ne.s32.totalorder %s2619_s19, 0 }
  0x7a   : > { %2041 = dma.done.wait (%p2642_p2), %s441_s26, 512  }
  0x7b   : > { %2043 = vsyncadd (%p2642_p2), %s441_s26, 4294966784  ;;  %s2333_s17 = sshll.u32 %s442_s7, 4  ;;  %p524_p7 = scmp.lt.s32.totalorder %s2066_s12, 1 }
  0x7c   : > { %s2643_s23 = sld [smem:[#allocation28_spill]]  ;;  %s453_s21 = scalar_lea.vmem [#allocation10], %s2333_s17 }
  0x7d   : > { %s525_s0 = scalar_select %p524_p7, %s2066_s12, 1 }
  0x7e   : > { %s2644_s28 = sld [smem:[#allocation27_spill]]  ;;  %s462_s30 = scalar_lea.vmem [#allocation11], %s2324_s22 }
  0x7f   : > { %s1652_s5 = smul.u32 48, %s525_s0  ;;  %s1552_s9 = sshll.u32 %s525_s0, 5 }
  0x80   : > { %s2350_s25 = scalar_lea.vmem [#allocation13], %s2333_s17  ;;  %s2353_s3 = scalar_lea.vmem [#allocation15], %s2333_s17 }
  0x81   : > { %p1502_p12 = scmp.ne.s32.totalorder %s2066_s12, 0 }
  0x82   : > { %s2340_s24 = scalar_lea.vmem %s2643_s23, %s1552_s9 }
  0x83   : > { %541 = sbr.rel (%p1502_p12) target bundleno = 139 (0x8b), region = 72 }
  0x84   : > { %s2345_s8 = scalar_lea.vmem %s2644_s28, %s1652_s5 }
  0x88   : > { %v542_v0 = vld [vmem:[#allocation4] sm:$0xff]  ;;  %vm544_vm0 = vcmask 261120   ;;  %v543_v1 = vld [vmem:[#allocation4 + $0x8] sm:$0xff]  ;;  %v547_v2 = vld [vmem:[#allocation7] sm:$0xff] }
  0x89   : > { %545 = vst.msk [vmem:[#allocation2] sm:$0xff] %vm544_vm0, %v542_v0  ;;  %546 = vst.msk [vmem:[#allocation2 + $0x8] sm:$0xff] %vm544_vm0, %v543_v1  ;;  %v548_v3 = vld [vmem:[#allocation7 + $0x8] sm:$0xff] }
  0x8a   : > { %549 = vst.msk [vmem:[#allocation3] sm:$0xff] %vm544_vm0, %v547_v2  ;;  %550 = vst.msk [vmem:[#allocation3 + $0x8] sm:$0xff] %vm544_vm0, %v548_v3 }
  0x8b PF: > { %vm583_vm1 = vcmask 1043456   ;;  %v2085_v6 = vmov 0.0   ;;  %vm2086_vm2 = vmmov 0   ;;  %v556_v9 = vld [vmem:[%s444_s29] sm:$0xf]  ;;  %vm579_vm3 = vcmask 64512  }
  0x8c   : > { %1584 = vmatprep.subr.bf16.mxu0 %v2085_v6  ;;  %1590 = vmatprep.subr.bf16.mxu1 %v2085_v6  ;;  %v1768_v10 = vld [vmem:[%s2345_s8 + $0x8] sm:$0xff]   ;;  %v1769_v13 = vld [vmem:[%s2345_s8] sm:$0xff]   ;;  %vm685_vm4 = vcmask 261120   ;;  %v1770_v31 = vld [vmem:[%s2345_s8 + $0x18] sm:$0xff]   ;;  %vm1037_vm5 = vcmask 523264   ;;  %p1539_p10 = scmp.ne.s32.totalorder %s2066_s12, 1 }
  0x8d   : > { %1586 = vmatprep.mubr.msk.bf16.mxu0 %vm2086_vm2, %v2085_v6  ;;  %1592 = vmatprep.mubr.msk.bf16.mxu1 %vm2086_vm2, %v2085_v6  ;;  %v1503_v30 = vld [vmem:[%s444_s29 + $0x4] sm:$0xf]  ;;  %v1771_v35 = vld [vmem:[%s2345_s8 + $0x10] sm:$0xff]  }
  0x8e   : > { %v1772_v2 = vld [vmem:[%s453_s21 + $0x8] sm:$0xff]   ;;  %v1773_v3 = vld [vmem:[%s453_s21] sm:$0xff]  }
  0x90   : > { %v551_v4 = vld [vmem:[#allocation2] sm:$0xff]  ;;  %v552_v5 = vld [vmem:[#allocation2 + $0x8] sm:$0xff] }
  0x91   : > { %v1553_v7 = vpack.c.bf16 %v551_v4, %v551_v4  ;;  %v1554_v8 = vpack.c.bf16 %v552_v5, %v552_v5 }
  0x93   : > { %v585_v11 = vsel %vm583_vm1, %v1553_v7, 0  ;;  %v628_v12 = vsel %vm583_vm1, %v1554_v8, 0 }
  0x94   : > { %1585 = vmatpush3.bf16.msra.mxu0 %v585_v11  ;;  %1591 = vmatpush3.bf16.msra.mxu1 %v628_v12 }
  0x95   : > { %1596 = vmatprep.subr.bf16.mxu0 %v2085_v6  ;;  %1604 = vmatprep.subr.bf16.mxu1 %v2085_v6 }
  0x97   : > { %1587 = vmatmul.mubr.msk.bf16.vlgmr.msra.gmra.mxu0 %vm579_vm3, %v556_v9  ;;  %1593 = vmatmul.mubr.msk.bf16.vlgmr.msra.gmra.mxu1 %vm579_vm3, %v556_v9 }
  0x98   : > { %1597 = vmatpush3.bf16.msra.mxu0 %v1768_v10  ;;  %1600 = vmatprep.mubr.msk.bf16.mxu0 %vm2086_vm2, %v2085_v6 }
  0x99   : > { %1598 = vmatprep.subr.bf16.mxu0 %v2085_v6  ;;  %1606 = vmatprep.mubr.msk.bf16.mxu1 %vm2086_vm2, %v2085_v6 }
  0x9c   : > { %1599 = vmatpush3.bf16.msra.mxu0 %v1769_v13  ;;  %v911_v13 = vlaneseq }
  0x9d   : > { %1610 = vmatprep.subr.bf16.mxu0 %v2085_v6 }
 0x157   : > { %v621_v14 = vpop.f32.mrf.mxu0  ;;  %v664_v15 = vpop.f32.mrf.mxu1 }
 0x158   : > { %v670_v16 = vsub.f32 %v551_v4, %v621_v14  ;;  %1196 = vst.msk [vmem:[%s2353_s3] sm:$0xff] %vm685_vm4, %v621_v14  ;;  %v671_v17 = vsub.f32 %v552_v5, %v664_v15  ;;  %1197 = vst.msk [vmem:[%s2353_s3 + $0x8] sm:$0xff] %vm685_vm4, %v664_v15  ;;  %v2420_v4 = vld [vmem:[%s462_s30] sm:$0xff] }
 0x159   : > { %v1588_v18 = vpop.f32.mrf.mxu0  ;;  %v1594_v19 = vpop.f32.mrf.mxu1  ;;  %v1125_v5 = vrot.slane %v2420_v4, 6 }
 0x15a   : > { %v672_v20 = vpack.c.bf16 %v671_v17, %v670_v16 }
 0x15b   : > { %v624_v21 = vpop.f32.mrf.mxu0  ;;  %v667_v22 = vpop.f32.mrf.mxu1  ;;  %1653 = vpush %v1125_v5 }
 0x15c   : > { %1601 = vmatmul.mubr.msk.bf16.vlgmr.msra.gmra.mxu0 %vm685_vm4, %v672_v20 }
 0x15d   : > { %v1589_v23 = vpop.f32.mrf.mxu0  ;;  %v1595_v24 = vpop.f32.mrf.mxu1  ;;  %1612 = vmatprep.mubr.msk.bf16.mxu0 %vm2086_vm2, %v2085_v6 }
 0x18c   : > { %s1654_s20 = spop %1653 }
 0x21c   : > { %v723_v25 = vpop.f32.mrf.mxu0 }
 0x21d   : > { %v1555_v26 = vpack.c.bf16 %v723_v25, %v723_v25 }
 0x21e   : > { %v1602_v27 = vpop.f32.mrf.mxu0 }
 0x21f   : > { %v740_v28 = vsel %vm583_vm1, %v1555_v26, 0  ;;  %v1774_v27 = vld [vmem:[%s2345_s8 + $0x28] sm:$0xff]  }
 0x220   : > { %v726_v29 = vpop.f32.mrf.mxu0  ;;  %1605 = vmatpush3.bf16.msra.mxu1 %v740_v28 }
 0x221   : > { %v1556_v32 = vpack.c.bf16 %v726_v29, %v726_v29  ;;  %1616 = vmatprep.subr.bf16.mxu1 %v2085_v6  ;;  %v1775_v29 = vld [vmem:[%s2345_s8 + $0x20] sm:$0xff]  }
 0x222   : > { %v1603_v33 = vpop.f32.mrf.mxu0 }
 0x223   : > { %v783_v34 = vsel %vm583_vm1, %v1556_v32, 0  ;;  %1607 = vmatmul.mubr.msk.bf16.vlgmr.msra.gmra.mxu1 %vm579_vm3, %v1503_v30  ;;  %v1778_v32 = vld [vmem:[%s2340_s24 + $0x8] sm:$0xff]   ;;  %v1779_v33 = vld [vmem:[%s2340_s24] sm:$0xff]  }
 0x224   : > { %1611 = vmatpush3.bf16.msra.mxu0 %v783_v34  ;;  %1617 = vmatpush3.bf16.msra.mxu1 %v1770_v31  ;;  %v1777_v31 = vld [vmem:[%s2340_s24 + $0x10] sm:$0xff]  }
 0x225   : > { %1618 = vmatprep.subr.bf16.mxu1 %v2085_v6  ;;  %1620 = vmatprep.mubr.msk.bf16.mxu1 %vm2086_vm2, %v2085_v6 }
 0x226   : > { %1624 = vmatprep.subr.bf16.mxu0 %v2085_v6 }
 0x227   : > { %1613 = vmatmul.mubr.msk.bf16.vlgmr.msra.gmra.mxu0 %vm579_vm3, %v1503_v30  ;;  %v1776_v30 = vld [vmem:[%s2340_s24 + $0x18] sm:$0xff]  }
 0x228   : > { %1628 = vmatprep.mubr.msk.bf16.mxu0 %vm2086_vm2, %v2085_v6  ;;  %1619 = vmatpush3.bf16.msra.mxu1 %v1771_v35 }
 0x229   : > { %1632 = vmatprep.subr.bf16.mxu1 %v2085_v6  ;;  %1625 = vmatpush3.bf16.msra.mxu0 %v1772_v2 }
 0x22a   : > { %1626 = vmatprep.subr.bf16.mxu0 %v2085_v6 }
 0x22d   : > { %1627 = vmatpush3.bf16.msra.mxu0 %v1773_v3 }
 0x22e   : > { %1644 = vmatprep.subr.bf16.mxu0 %v2085_v6 }
 0x2e3   : > { %v776_v36 = vpop.f32.mrf.mxu1 }
 0x2e5   : > { %v1608_v37 = vpop.f32.mrf.mxu1 }
 0x2e7   : > { %v819_v38 = vpop.f32.mrf.mxu0  ;;  %v779_v39 = vpop.f32.mrf.mxu1 }
 0x2e8   : > { %v825_v40 = vpack.c.bf16 %v819_v38, %v776_v36  ;;  %v553_v39 = vld [vmem:[#allocation3] sm:$0xff] }
 0x2e9   : > { %v1614_v41 = vpop.f32.mrf.mxu0  ;;  %v1609_v42 = vpop.f32.mrf.mxu1 }
 0x2ea   : > { %1621 = vmatmul.mubr.msk.bf16.vlgmr.msra.gmra.mxu1 %vm685_vm4, %v825_v40  ;;  %v1127_v40 = vstv %s1654_s20 }
 0x2eb   : > { %v822_v43 = vpop.f32.mrf.mxu0  ;;  %1640 = vmatprep.mubr.msk.bf16.mxu1 %vm2086_vm2, %v2085_v6  ;;  %1633 = vmatpush3.bf16.msra.mxu1 %v1776_v30 }
 0x2ec   : > { %1634 = vmatprep.subr.bf16.mxu1 %v2085_v6 }
 0x2ed   : > { %v1615_v44 = vpop.f32.mrf.mxu0 }
 0x2ee   : > { %v1129_v44 = vmul.f32 %v1127_v40, %v553_v39 }
 0x2ef   : > { %1635 = vmatpush3.bf16.msra.mxu1 %v1777_v31 }
 0x2f0   : > { %1636 = vmatprep.subr.bf16.mxu1 %v2085_v6 }
 0x2f3   : > { %1637 = vmatpush3.bf16.msra.mxu1 %v1778_v32 }
 0x2f4   : > { %1638 = vmatprep.subr.bf16.mxu1 %v2085_v6 }
 0x2f7   : > { %1639 = vmatpush3.bf16.msra.mxu1 %v1779_v33 }
 0x3aa   : > { %v875_v45 = vpop.f32.mrf.mxu1 }
 0x3ab   : > { %1194 = vst.msk [vmem:[%s2350_s25] sm:$0xff] %vm685_vm4, %v875_v45  ;;  %v882_v46 = vsub.f32 %v670_v16, %v875_v45  ;;  %v1122_v50 = vadd.f32 %v875_v45, %v621_v14  ;;  %v2423_v14 = vshrl.u32 %v911_v13, 7  ;;  %v554_v45 = vld [vmem:[#allocation3 + $0x8] sm:$0xff] }
 0x3ac   : > { %v1622_v47 = vpop.f32.mrf.mxu1 }
 0x3ad   : > { %v884_v48 = vsel %vm685_vm4, %v882_v46, 0.0  ;;  %v919_v19 = vsub.s32 1, %v2423_v14  ;;  %v930_v34 = vsub.s32 5, %v2423_v14 }
 0x3ae   : > { %885 = vadd.xlane.f32.xlu0 %v884_v48  ;;  %v878_v49 = vpop.f32.mrf.mxu1  ;;  %v1130_v48 = vmul.f32 %v1127_v40, %v554_v45 }
 0x3af   : > { %v1123_v51 = vadd.f32 %v878_v49, %v664_v15  ;;  %1195 = vst.msk [vmem:[%s2350_s25 + $0x8] sm:$0xff] %vm685_vm4, %v878_v49  ;;  %v883_v52 = vsub.f32 %v671_v17, %v878_v49  ;;  %v913_v15 = vsub.s32 0, %v2423_v14  ;;  %v920_v23 = vrot.slane %v2420_v4, %v919_v19 }
 0x3b0   : > { %v1623_v53 = vpop.f32.mrf.mxu1  ;;  %v931_v35 = vrot.slane %v2420_v4, %v930_v34 }
 0x3b1   : > { %v1131_v54 = vpack.c.bf16 %v1123_v51, %v1122_v50  ;;  %v887_v55 = vsel %vm685_vm4, %v883_v52, 0.0  ;;  %v914_v18 = vrot.slane %v2420_v4, %v913_v15 }
 0x3b2   : > { %888 = vadd.xlane.f32.xlu0 %v887_v55 }
 0x437   : > { %v886_v56 = vpop.xlane.xlu0 %885 }
 0x438   : > { %v891_v57 = vmul.f32 0.03125, %v886_v56 }
 0x43a   : > { %v893_v58 = vsub.f32 %v882_v46, %v891_v57 }
 0x43b   : > { %v889_v59 = vpop.xlane.xlu0 %888 }
 0x43c   : > { %v892_v60 = vmul.f32 0.03125, %v889_v59  ;;  %v895_v61 = vmul.f32 %v893_v58, %v893_v58 }
 0x43e   : > { %v894_v62 = vsub.f32 %v883_v52, %v892_v60  ;;  %v897_v63 = vsel %vm685_vm4, %v895_v61, 0.0  ;;  %v1011_v61 = vsub.s32 4, %v2423_v14 }
 0x43f   : > { %898 = vadd.xlane.f32.xlu1 %v897_v63 }
 0x440   : > { %v896_v0 = vmul.f32 %v894_v62, %v894_v62 }
 0x442   : > { %v900_v1 = vsel %vm685_vm4, %v896_v0, 0.0 }
 0x443   : > { %901 = vadd.xlane.f32.xlu1 %v900_v1 }
 0x4c8   : > { %v899_v7 = vpop.xlane.xlu1 %898 }
 0x4c9   : > { %v903_v8 = vmul.f32 0.03125, %v899_v7 }
 0x4cb   : > { %v905_v9 = vadd.f32 1e-05, %v903_v8 }
 0x4cc   : > { %v902_v10 = vpop.xlane.xlu1 %901 }
 0x4cd   : > { %1780 = vrsqrt.f32 %v905_v9  ;;  %v904_v11 = vmul.f32 0.03125, %v902_v10 }
 0x4cf   : > { %v906_v12 = vadd.f32 1e-05, %v904_v11 }
 0x4d1   : > { %1782 = vrsqrt.f32 %v906_v12 }
 0x4da   : > { %v1781_v16 = vpop.eup %1780 }
 0x4db   : > { %v909_v17 = vmul.f32 %v1781_v16, %v893_v58 }
 0x4dd   : > { %v915_v22 = vmul.f32 %v914_v18, %v909_v17 }
 0x4de   : > { %v1783_v20 = vpop.eup %1782 }
 0x4df   : > { %v910_v21 = vmul.f32 %v1783_v20, %v894_v62  ;;  %v2429_v25 = vadd.f32 %v920_v23, %v915_v22  ;;  %v1012_v62 = vrot.slane %v2420_v4, %v1011_v61 }
 0x4e1   : > { %v916_v24 = vmul.f32 %v914_v18, %v910_v21 }
 0x4e3   : > { %v2431_v26 = vadd.f32 %v920_v23, %v916_v24 }
 0x4e5   : > { %v923_v28 = vpack.c.bf16 %v2431_v26, %v2429_v25 }
 0x4e7   : > { %1629 = vmatmul.mubr.msk.bf16.vlgmr.msra.gmra.mxu0 %vm685_vm4, %v923_v28  ;;  %v1112_v28 = vsub.s32 2, %v2423_v14 }
 0x4e8   : > { %1645 = vmatpush3.bf16.msra.mxu0 %v1774_v27  ;;  %1648 = vmatprep.mubr.msk.bf16.mxu0 %vm2086_vm2, %v2085_v6 }
 0x4e9   : > { %1646 = vmatprep.subr.bf16.mxu0 %v2085_v6  ;;  %v1113_v30 = vrot.slane %v2420_v4, %v1112_v28 }
 0x4ec   : > { %1647 = vmatpush3.bf16.msra.mxu0 %v1775_v29  ;;  %v1118_v29 = vsub.s32 3, %v2423_v14 }
 0x4ee   : > { %v1119_v32 = vrot.slane %v2420_v4, %v1118_v29 }
 0x4ef   : > { %1649 = vmatmul.mubr.msk.bf16.vlgmr.msra.gmra.mxu0 %vm685_vm4, %v1131_v54 }
 0x5a7   : > { %v981_v36 = vpop.f32.mrf.mxu0 }
 0x5a8   : > { %v982_v37 = vadd.f32 %v981_v36, %v931_v35 }
 0x5a9   : > { %v1630_v38 = vpop.f32.mrf.mxu0 }
 0x5aa   : > { %v1529_v41 = vmul.f32 -1.442695, %v982_v37 }
 0x5ab   : > { %v984_v42 = vpop.f32.mrf.mxu0 }
 0x5ac   : > { %1784 = vpow2.f32 %v1529_v41  ;;  %v985_v43 = vadd.f32 %v984_v42, %v931_v35 }
 0x5ad   : > { %v1631_v46 = vpop.f32.mrf.mxu0 }
 0x5ae   : > { %v1530_v47 = vmul.f32 -1.442695, %v985_v43 }
 0x5af   : > { %v1181_v6 = vpop.f32.mrf.mxu0 }
 0x5b0   : > { %1786 = vpow2.f32 %v1530_v47  ;;  %v2451_v49 = vadd.f32 %v1181_v6, %v1129_v44 }
 0x5b1   : > { %v1650_v50 = vpop.f32.mrf.mxu0 }
 0x5b2   : > { %1192 = vst.msk [vmem:[#allocation3] sm:$0xff] %vm685_vm4, %v2451_v49 }
 0x5b3   : > { %v1184_v51 = vpop.f32.mrf.mxu0 }
 0x5b4   : > { %v2455_v52 = vadd.f32 %v1184_v51, %v1130_v48 }
 0x5b5   : > { %v1651_v53 = vpop.f32.mrf.mxu0 }
 0x5b6   : > { %1193 = vst.msk [vmem:[#allocation3 + $0x8] sm:$0xff] %vm685_vm4, %v2455_v52 }
 0x5b9   : > { %v1785_v54 = vpop.eup %1784 }
 0x5ba   : > { %v994_v55 = vadd.f32 1.0, %v1785_v54 }
 0x5bc   : > { %1788 = vrcp.f32 %v994_v55 }
 0x5bd   : > { %v1787_v56 = vpop.eup %1786 }
 0x5be   : > { %v995_v57 = vadd.f32 1.0, %v1787_v56 }
 0x5c0   : > { %1790 = vrcp.f32 %v995_v57 }
 0x5c9   : > { %v1789_v58 = vpop.eup %1788 }
 0x5cd   : > { %v1791_v59 = vpop.eup %1790 }
 0x5ce   : > { %v1000_v60 = vpack.c.bf16 %v1791_v59, %v1789_v58 }
 0x5d0   : > { %1641 = vmatmul.mubr.msk.bf16.vlgmr.msra.gmra.mxu1 %vm1037_vm5, %v1000_v60 }
 0x690   : > { %v1075_v63 = vpop.f32.mrf.mxu1 }
 0x691   : > { %v1076_v0 = vadd.f32 %v1075_v63, %v1012_v62 }
 0x692   : > { %v1642_v1 = vpop.f32.mrf.mxu1 }
 0x693   : > { %v1082_v2 = vadd.f32 %v1076_v0, %v2429_v25 }
 0x694   : > { %v1078_v3 = vpop.f32.mrf.mxu1 }
 0x695   : > { %v1079_v5 = vadd.f32 %v1078_v3, %v1012_v62  ;;  %v1084_v7 = vsel %vm685_vm4, %v1082_v2, 0.0 }
 0x696   : > { %1085 = vadd.xlane.f32.xlu0 %v1084_v7  ;;  %v1643_v8 = vpop.f32.mrf.mxu1 }
 0x697   : > { %v1083_v9 = vadd.f32 %v1079_v5, %v2431_v26 }
 0x699   : > { %v1087_v10 = vsel %vm685_vm4, %v1083_v9, 0.0 }
 0x69a   : > { %1088 = vadd.xlane.f32.xlu1 %v1087_v10 }
 0x71f   : > { %v1086_v11 = vpop.xlane.xlu0 %1085 }
 0x720   : > { %v1090_v12 = vmul.f32 0.03125, %v1086_v11 }
 0x722   : > { %v1092_v13 = vsub.f32 %v1082_v2, %v1090_v12 }
 0x723   : > { %v1089_v15 = vpop.xlane.xlu1 %1088 }
 0x724   : > { %v1091_v16 = vmul.f32 0.03125, %v1089_v15  ;;  %v1094_v17 = vmul.f32 %v1092_v13, %v1092_v13 }
 0x726   : > { %v1093_v18 = vsub.f32 %v1083_v9, %v1091_v16  ;;  %v1096_v19 = vsel %vm685_vm4, %v1094_v17, 0.0 }
 0x727   : > { %1097 = vadd.xlane.f32.xlu0 %v1096_v19 }
 0x728   : > { %v1095_v20 = vmul.f32 %v1093_v18, %v1093_v18 }
 0x72a   : > { %v1099_v21 = vsel %vm685_vm4, %v1095_v20, 0.0 }
 0x72b   : > { %1100 = vadd.xlane.f32.xlu1 %v1099_v21 }
 0x7b0   : > { %v1098_v22 = vpop.xlane.xlu0 %1097 }
 0x7b1   : > { %v1102_v23 = vmul.f32 0.03125, %v1098_v22 }
 0x7b3   : > { %v1104_v24 = vadd.f32 1e-05, %v1102_v23 }
 0x7b4   : > { %v1101_v25 = vpop.xlane.xlu1 %1100 }
 0x7b5   : > { %1792 = vrsqrt.f32 %v1104_v24  ;;  %v1103_v26 = vmul.f32 0.03125, %v1101_v25 }
 0x7b7   : > { %v1105_v27 = vadd.f32 1e-05, %v1103_v26 }
 0x7b9   : > { %1794 = vrsqrt.f32 %v1105_v27 }
 0x7c2   : > { %v1793_v31 = vpop.eup %1792 }
 0x7c3   : > { %v1108_v33 = vmul.f32 %v1793_v31, %v1092_v13 }
 0x7c5   : > { %v1114_v34 = vmul.f32 %v1113_v30, %v1108_v33 }
 0x7c6   : > { %v1795_v35 = vpop.eup %1794 }
 0x7c7   : > { %v1120_v36 = vadd.f32 %v1119_v32, %v1114_v34  ;;  %v1109_v37 = vmul.f32 %v1795_v35, %v1093_v18 }
 0x7c9   : > { %1190 = vst.msk [vmem:[#allocation2] sm:$0xff] %vm685_vm4, %v1120_v36  ;;  %v1115_v38 = vmul.f32 %v1113_v30, %v1109_v37  ;;  %1201 = sbr.rel (%p1539_p10) target bundleno = 1999 (0x7cf), region = 76 }
 0x7cb   : > { %v1121_v39 = vadd.f32 %v1119_v32, %v1115_v38 }
 0x7cd   : > { %1191 = vst.msk [vmem:[#allocation2 + $0x8] sm:$0xff] %vm685_vm4, %v1121_v39 }
 0x7ce   : > { %1202 = vst.msk [vmem:[#allocation12] sm:$0xff] %vm685_vm4, %v2451_v49  ;;  %1203 = vst.msk [vmem:[#allocation12 + $0x8] sm:$0xff] %vm685_vm4, %v2455_v52 }
 0x7cf PF: > { %s2645_s7 = sld [smem:[#allocation21_spill]]  ;;  %s1557_s22 = sshll.u32 %s2066_s12, 8 }
 0x7d0   : > { %s2646_s17 = sld [smem:[#allocation30_spill]]  ;;  %s1241_s5 = sshll.u32 %s2350_s25, 4  ;;  %s2485_s5 = int_to_ptr.vmem [resolvable:$true] %s1241_s5 }
 0x7d1   : > { %s2647_s18 = sld [smem:[#allocation31_spill]]  ;;  %s2494_s24 = scalar_lea.sflag [#allocation14], %s440_s2 }
 0x7d2   : > { %s1932_s12 = scalar_lea.vmem %s2485_s5, 256  ;;  %s2087_s16 = smov [#allocation13]  }
 0x7d3   : > { %p1933_p8 = scmp.ne.s32.totalorder %s2485_s5, %s1932_s12  ;;  %s1936_s19 = sshll.u32 %s2087_s16, 4  ;;  %s1937_s19 = int_to_ptr.vmem [resolvable:$false] %s1936_s19 }
 0x7d4   : > { %s1938_s28 = scalar_lea.vmem %s1937_s19, 512  ;;  %p1939_p11 = scmp.lt.s32.totalorder %s2485_s5, %s1937_s19 }
 0x7d5   : > { %p2648_p0 = scmp.ne.s32.totalorder %s2645_s7, 0  ;;  %p1940_p13 = scmp.lt.s32.totalorder %s1938_s28, %s1932_s12 }
 0x7d6   : > { %s2482_s0 = scalar_lea.hbm %s2646_s17, %s1557_s22 }
 0x7d7   : > { %s2490_s23 = scalar_lea.hbm %s2647_s18, %s1557_s22  ;;  %p1934_p4 = pnand %p1933_p8, %p2648_p0 }
 0x7d8   : > { %p1941_p5 = por %p1940_p13, %p1939_p11 }
 0x7d9   : > { %p1935_p6 = pneg %p1934_p4 }
 0x7db   : > { %p1942_p3 = pnand %p1941_p5, %p1935_p6 }
 0x7dd   : > { %1945 = shalt.err (!%p1942_p3)
}
 0x7de   : > { %s1946_s2 = scalar_lea.hbm %s2482_s0, 256  ;;  %s1950_s30 = scalar_lea.hbm %s2646_s17, 512 }
 0x7df   : > { %p1947_p9 = scmp.ne.s32.totalorder %s2482_s0, %s1946_s2  ;;  %p1951_p7 = scmp.lt.s32.totalorder %s2482_s0, %s2646_s17 }
 0x7e0   : > { %p1952_p12 = scmp.lt.s32.totalorder %s1950_s30, %s1946_s2 }
 0x7e1   : > { %p1948_p1 = pnand %p1947_p9, %p2648_p0 }
 0x7e2   : > { %p1953_p10 = por %p1952_p12, %p1951_p7 }
 0x7e3   : > { %p1949_p2 = pneg %p1948_p1 }
 0x7e5   : > { %p1954_p8 = pnand %p1953_p10, %p1949_p2 }
 0x7e7   : > { %1957 = shalt.err (!%p1954_p8)
}
 0x7e8   : > { %s2088_s22 = smov 128   ;;  %s2089_s26 = smov 8  }
 0x7e9   : > { %1671 = dma.vmem_to_hbm [thread:$0]  (%p2648_p0), %s2485_s5, 256, %s2482_s0, %s2494_s24, %s2088_s22, %s2088_s22, %s2089_s26  }
 0x7ea   : > { %s2090_s29 = smov [#allocation12]   ;;  %s1259_s27 = sshll.u32 %s2353_s3, 4  ;;  %s2521_s27 = int_to_ptr.vmem [resolvable:$true] %s1259_s27 }
 0x7eb   : > { %s1223_s9 = sshll.u32 %s2090_s29, 4  ;;  %p2649_p6 = scmp.eq.s32.totalorder %s2171_s15, 1  ;;  %s1224_s9 = int_to_ptr.vmem [resolvable:$true] %s1223_s9 }
 0x7ec   : > { %s1958_s12 = scalar_lea.vmem %s1224_s9, 256  ;;  %p1965_p5 = scmp.lt.s32.totalorder %s1224_s9, %s1224_s9 }
 0x7ed   : > { %p1959_p4 = scmp.ne.s32.totalorder %s1224_s9, %s1958_s12  ;;  %p1966_p3 = scmp.lt.s32.totalorder %s1958_s12, %s1958_s12 }
 0x7ef   : > { %p1960_p11 = pnand %p1959_p4, %p2649_p6  ;;  %p1967_p9 = por %p1966_p3, %p1965_p5 }
 0x7f1   : > { %p1961_p13 = pneg %p1960_p11 }
 0x7f3   : > { %p1968_p1 = pnand %p1967_p9, %p1961_p13 }
 0x7f5   : > { %1971 = shalt.err (!%p1968_p1)
}
 0x7f6   : > { %p2650_p2 = pmov %p2649_p6  ;;  %s2651_s5 = sld [smem:[#allocation29_spill]] }
 0x7f7   : > { %s1982_s16 = scalar_lea.vmem %s2521_s27, 256  ;;  %s2091_s19 = smov [#allocation15]  }
 0x7f8   : > { %p1983_p7 = scmp.ne.s32.totalorder %s2521_s27, %s1982_s16  ;;  %s1986_s28 = sshll.u32 %s2091_s19, 4  ;;  %s1987_s28 = int_to_ptr.vmem [resolvable:$false] %s1986_s28 }
 0x7f9   : > { %s1988_s2 = scalar_lea.vmem %s1987_s28, 512  ;;  %p1989_p8 = scmp.lt.s32.totalorder %s2521_s27, %s1987_s28 }
 0x7fa   : > { %p1984_p12 = pnand %p1983_p7, %p2648_p0  ;;  %p1990_p4 = scmp.lt.s32.totalorder %s1988_s2, %s1982_s16 }
 0x7fc   : > { %1670 = dma.vmem_to_hbm [thread:$0]  (%p2650_p2), %s1224_s9, 256, %s2651_s5, [#allocation6], %s2088_s22, %s2088_s22, %s2089_s26  }
 0x7fd   : > { %p1985_p10 = pneg %p1984_p12  ;;  %p1991_p6 = por %p1990_p4, %p1989_p8 }
 0x7ff   : > { %p1992_p11 = pnand %p1991_p6, %p1985_p10 }
 0x801   : > { %1995 = shalt.err (!%p1992_p11)
}
 0x802   : > { %s1996_s8 = scalar_lea.hbm %s2490_s23, 256  ;;  %s2000_s25 = scalar_lea.hbm %s2647_s18, 512 }
 0x803   : > { %p1997_p13 = scmp.ne.s32.totalorder %s2490_s23, %s1996_s8  ;;  %p2001_p9 = scmp.lt.s32.totalorder %s2490_s23, %s2647_s18 }
 0x804   : > { %p2002_p1 = scmp.lt.s32.totalorder %s2000_s25, %s1996_s8 }
 0x805   : > { %p1998_p5 = pnand %p1997_p13, %p2648_p0 }
 0x806   : > { %p2003_p2 = por %p2002_p1, %p2001_p9 }
 0x807   : > { %p1999_p3 = pneg %p1998_p5 }
 0x809   : > { %p2004_p7 = pnand %p2003_p2, %p1999_p3 }
 0x80b   : > { %2007 = shalt.err (!%p2004_p7)
}
 0x80c   : > { %1672 = dma.vmem_to_hbm [thread:$0]  (%p2648_p0), %s2521_s27, 256, %s2490_s23, %s2494_s24, %s2088_s22, %s2088_s22, %s2089_s26  }
 0x80d   : > { %p2652_p12 = scmp.eq.s32.totalorder %s2171_s15, 1 }
 0x80f   : > { %2045 = dma.done.wait (%p2652_p12), [#allocation6], 256   ;;  %p2653_p10 = pmov %p2652_p12 }
 0x811   : > { %2047 = vsyncadd (%p2653_p10), [#allocation6], 4294967040 }
 0x812 PF: > { %s2654_s9 = sadd.s32 4294967294, %s2074_s14   ;;  %s2655_s12 = sld [smem:[#allocation22_spill]] }
 0x813   : > { %s1278_s0 = sand.u32 1, %s2654_s9   ;;  %p2657_p4 = scmp.ge.s32.totalorder %s2074_s14, 2 }
 0x814   : > { %s1279_s7 = scalar_lea.sflag [#allocation14], %s1278_s0 }
 0x818   : > { %p2656_p8 = scmp.ne.s32.totalorder %s2655_s12, 0 }
 0x81a   : > { %p1695_p6 = pnand %p2657_p4, %p2656_p8 }
 0x81c   : > { %p1696_p11 = pneg %p1695_p6 }
 0x81e   : > { %2049 = dma.done.wait (%p1696_p11), %s1279_s7, 512  }
 0x81f   : > { %2051 = vsyncadd (%p1696_p11), %s1279_s7, 4294966784  ;;  %s26_s14 = sadd.s32 1, %s2074_s14   ;;  %s2658_s15 = sld [smem:[#allocation24_spill]] }
 0x820   : > { %p23_p0 = scmp.ge.s32.totalorder %s26_s14, 4   ;;  %s2659_s23 = sld [smem:[#allocation23_spill]] }
 0x821   : > { %s2660_s30 = smov %s2058_s10  ;;  %s2661_s10 = smov %s2062_s11 }
 0x822   : > { %s2663_s12 = smov %s2070_s13  ;;  %25 = sbr.rel (!%p23_p0) target bundleno = 15 (0xf), region = 166 }
 0x825   : > { %s2662_s11 = smov %s2658_s15 }
 0x826   : > { %s2664_s13 = smov %s2659_s23 }
 0x827   :  { %1293 = vsyncpa [#allocation5], 1 }
 0x828   :  { %1295 = vsyncpa [#allocation5 + $0x1], 1 }
 0x829   :  { %1296 = vsyncpa [#allocation8], 1 }
 0x82a   :  { %1297 = vsyncpa [#allocation6], 1 }
 0x82b   :  { %1299 = vsyncpa [#allocation6 + $0x1], 1 }
 0x82c   :  { %1300 = vsyncpa [#allocation14], 1 }
 0x82d   :  { %1302 = vsyncpa [#allocation14 + $0x1], 1 }

</bundles_post_ra>
